<compile_context>
chip_gen: v7x
topology: tpu7x:2x2x1
jax: 0.10.0
libtpu: 0.0.40
codegen_flags: <defaults>
</compile_context>

<pallas_src>
import jax
import jax.numpy as jnp
from jax import lax
from jax.experimental import pallas as pl
from jax.experimental.pallas import tpu as pltpu

LANES = 128    # lane width (last dim of every block)
SUB = 8        # f32 sublanes -> height of the per-tile partial-sum block
CHUNK_R = 32   # rows per fused inner-loop chunk (keeps temporaries in vregs)


def _round_up(x, m):
    return ((x + m - 1) // m) * m


def _vmem_capacity_bytes():
    cap = 64 << 20  # conservative default (v7x per-core VMEM)
    try:
        info = pltpu.get_tpu_info()
        cap = int(getattr(info, "vmem_capacity_bytes", cap)) or cap
    except Exception:
        pass
    return cap


def _make_bce_partial_kernel(tile_r, total_rows, need_mask):
    """Per-tile kernel: fused BCE + reduction to one (8, 128) partial-sum block."""
    n_chunks, rem_r = divmod(tile_r, CHUNK_R)

    def kernel(pred_ref, targ_ref, out_ref):
        base_row = pl.program_id(0) * tile_r

        # Hoisted row-index iotas (only needed when the last tile is ragged).
        iota_chunk = iota_tail = None
        if need_mask:
            if n_chunks:
                iota_chunk = lax.broadcasted_iota(jnp.int32, (CHUNK_R, LANES), 0)
            if rem_r:
                iota_tail = lax.broadcasted_iota(jnp.int32, (rem_r, LANES), 0)

        def chunk_sum(r0, cr, iota_cr, acc):
            p = pred_ref[pl.ds(r0, cr), :].astype(jnp.float32)
            t = targ_ref[pl.ds(r0, cr), :].astype(jnp.float32)
            # PyTorch BCELoss clamps each log term at -100.  NOTE: the clamp must
            # happen BEFORE the multiply by the target weight -- this keeps
            # 0 * log(0) finite and makes the (pred=1, target=1) element padding
            # contribute exactly 0.  Do not reorder.
            log_p = jnp.maximum(jnp.log(p), -100.0)
            log_1mp = jnp.maximum(jnp.log(1.0 - p), -100.0)
            # == -(t*log_p + (1-t)*log_1mp), one multiply saved.
            loss = -(log_1mp + t * (log_p - log_1mp))
            if need_mask:
                # Ragged last tile: rows >= total_rows are out-of-bounds garbage;
                # force their contribution to exactly 0 (select also neutralizes NaN).
                row = base_row + r0 + iota_cr
                loss = jnp.where(row < total_rows, loss, 0.0)
            # Layout-preserving fold of cr rows onto 8 sublanes (pure VALU adds).
            return acc + jnp.sum(loss.reshape(cr // SUB, SUB, LANES), axis=0)

        acc = jnp.zeros((SUB, LANES), jnp.float32)
        if n_chunks:
            acc = lax.fori_loop(
                0, n_chunks,
                lambda c, a: chunk_sum(pl.multiple_of(c * CHUNK_R, CHUNK_R),
                                       CHUNK_R, iota_chunk, a),
                acc)
        if rem_r:
            acc = chunk_sum(n_chunks * CHUNK_R, rem_r, iota_tail, acc)
        out_ref[...] = acc

    return kernel


def mm_bce_loss(pred, target, loss_weight=1.0, max_tile_rows=None):
    """Equivalent of MMBCELoss.forward: loss_weight * BCELoss(reduction='mean')(pred, target)."""
    assert pred.shape == target.shape
    n = pred.size
    assert n > 0

    isz_p = jnp.dtype(pred.dtype).itemsize
    isz_t = jnp.dtype(target.dtype).itemsize
    # Sublane alignment for the narrowest streamed dtype (8 for f32, 16 for bf16, ...).
    row_align = max(SUB, 32 // min(isz_p, isz_t))

    p_flat = pred.reshape(-1)
    t_flat = target.reshape(-1)

    # Tiny element-level padding only (<= row_align*128 - 1 elems).  pred=1 / target=1
    # gives exactly zero loss thanks to the clamp-before-multiply in the kernel.
    n_padded = _round_up(n, row_align * LANES)
    pad = n_padded - n
    if pad:
        p_flat = jnp.pad(p_flat, (0, pad), constant_values=1)
        t_flat = jnp.pad(t_flat, (0, pad), constant_values=1)
    rows = n_padded // LANES  # multiple of row_align

    # ---- Generation-aware tiling -------------------------------------------------
    vmem_cap = _vmem_capacity_bytes()
    # Budget ~1/8 of physical VMEM for (2 inputs x 2 pipeline buffers):
    #   v5e/v6e (128 MiB): 8192 f32 rows/step (4 MiB of HBM traffic per step)
    #   v7x      (64 MiB): 4096 f32 rows/step
    budget = vmem_cap // 8
    per_row_buf_bytes = 2 * LANES * (isz_p + isz_t)          # both inputs, double-buffered
    max_tile_r = max(row_align, (budget // per_row_buf_bytes) // 64 * 64)
    if max_tile_rows is not None:
        max_tile_r = max(row_align, min(max_tile_r, _round_up(max_tile_rows, row_align)))

    # Keep >= 2 grid steps for non-tiny inputs so v7x's 2nd TensorCore gets work.
    min_tiles = 2 if rows >= 128 else 1
    num_tiles = max(pl.cdiv(rows, max_tile_r), min_tiles)
    tile_r = _round_up(pl.cdiv(rows, num_tiles), row_align)   # <= max_tile_r, <= rows
    num_tiles = pl.cdiv(rows, tile_r)
    need_mask = (rows % tile_r) != 0

    p2d = p_flat.reshape(rows, LANES)
    t2d = t_flat.reshape(rows, LANES)

    buf_bytes = tile_r * per_row_buf_bytes
    vmem_limit = int(min(vmem_cap * 3 // 4, buf_bytes + (32 << 20)))

    kernel = _make_bce_partial_kernel(tile_r, rows, need_mask)

    partial = pl.pallas_call(
        kernel,
        out_shape=jax.ShapeDtypeStruct((num_tiles * SUB, LANES), jnp.float32),
        grid_spec=pltpu.PrefetchScalarGridSpec(
            num_scalar_prefetch=0,
            grid=(num_tiles,),
            in_specs=[
                pl.BlockSpec((tile_r, LANES), lambda i: (i, 0)),
                pl.BlockSpec((tile_r, LANES), lambda i: (i, 0)),
            ],
            out_specs=pl.BlockSpec((SUB, LANES), lambda i: (i, 0)),
        ),
        compiler_params=pltpu.CompilerParams(
            dimension_semantics=("parallel",),
            vmem_limit_bytes=vmem_limit,
        ),
    )(p2d, t2d)

    # Tiny final reduction + mean + loss_weight in plain JAX.
    mean = jnp.sum(partial, dtype=jnp.float32) / jnp.float32(n)
    return jnp.asarray(loss_weight, jnp.float32) * mean


def _bce_ref(pred, target, loss_weight=1.0):
    p = pred.astype(jnp.float32)
    t = target.astype(jnp.float32)
    log_p = jnp.maximum(jnp.log(p), -100.0)
    log_1mp = jnp.maximum(jnp.log(1.0 - p), -100.0)
    return jnp.float32(loss_weight) * jnp.mean(-(t * log_p + (1.0 - t) * log_1mp))


if __name__ == "__main__":
    key = jax.random.PRNGKey(0)
    k1, k2, k3, k4 = jax.random.split(key, 4)

    # Main case: (B, C, H, W) = (2, 4, 16, 16), lane-aligned, single tile.
    B, C, H, W = 2, 4, 16, 16
    pred = jax.nn.sigmoid(jax.random.normal(k1, (B, C, H, W), dtype=jnp.float32))
    target = jax.random.bernoulli(k2, 0.5, (B, C, H, W)).astype(jnp.float32)
    out = jax.block_until_ready(mm_bce_loss(pred, target, loss_weight=1.0))
    ref = _bce_ref(pred, target, loss_weight=1.0)
    assert jnp.allclose(out, ref, rtol=1e-5, atol=1e-6), (out, ref)

    # Ragged case: exercises element padding, 2 grid steps and the in-kernel row mask
    # (max_tile_rows forces small tiles so the last tile is ragged).
    pred2 = jax.nn.sigmoid(jax.random.normal(k3, (2, 5, 5, 50), dtype=jnp.float32))
    target2 = jax.random.bernoulli(k4, 0.5, (2, 5, 5, 50)).astype(jnp.float32)
    out2 = jax.block_until_ready(mm_bce_loss(pred2, target2, loss_weight=0.5, max_tile_rows=16))
    ref2 = _bce_ref(pred2, target2, loss_weight=0.5)
    assert jnp.allclose(out2, ref2, rtol=1e-5, atol=1e-6), (out2, ref2)

    print("KERNEL_OK")
</pallas_src>

<mosaic_0001>
module attributes {stable_mosaic.version = 11 : i64} {
  func.func @kernel(%arg0: i32, %arg1: memref<16x128xf32, #tpu.memory_space<vmem>>, %arg2: memref<16x128xf32, #tpu.memory_space<vmem>>, %arg3: memref<8x128xf32, #tpu.memory_space<vmem>>) attributes {dimension_semantics = [#tpu.dimension_semantics<parallel>], iteration_bounds = array<i64: 1>, scalar_prefetch = 0 : i64, scratch_operands = 0 : i64, tpu.core_type = #tpu.core_type<tc>, window_params = [{transform_indices = @transform_0, window_bounds = array<i64: 16, 128>}, {transform_indices = @transform_1, window_bounds = array<i64: 16, 128>}, {transform_indices = @transform_2, window_bounds = array<i64: 8, 128>}]} {
    %cst = arith.constant 0.000000e+00 : f32
    %0 = vector.broadcast %cst : f32 to vector<8x128xf32>
    %c0 = arith.constant 0 : index
    %c0_0 = arith.constant 0 : index
    %1 = vector.load %arg1[%c0, %c0_0] : memref<16x128xf32, #tpu.memory_space<vmem>>, vector<16x128xf32>
    %c0_1 = arith.constant 0 : index
    %c0_2 = arith.constant 0 : index
    %2 = vector.load %arg2[%c0_1, %c0_2] : memref<16x128xf32, #tpu.memory_space<vmem>>, vector<16x128xf32>
    %3 = math.log %1 : vector<16x128xf32>
    %cst_3 = arith.constant -1.000000e+02 : f32
    %4 = vector.broadcast %cst_3 : f32 to vector<16x128xf32>
    %5 = arith.maximumf %3, %4 : vector<16x128xf32>
    %cst_4 = arith.constant 1.000000e+00 : f32
    %6 = vector.broadcast %cst_4 : f32 to vector<16x128xf32>
    %7 = arith.subf %6, %1 : vector<16x128xf32>
    %8 = math.log %7 : vector<16x128xf32>
    %cst_5 = arith.constant -1.000000e+02 : f32
    %9 = vector.broadcast %cst_5 : f32 to vector<16x128xf32>
    %10 = arith.maximumf %8, %9 : vector<16x128xf32>
    %11 = arith.subf %5, %10 : vector<16x128xf32>
    %12 = arith.mulf %2, %11 : vector<16x128xf32>
    %13 = arith.addf %10, %12 : vector<16x128xf32>
    %cst_6 = arith.constant 0.000000e+00 : f32
    %14 = vector.broadcast %cst_6 : f32 to vector<16x128xf32>
    %15 = arith.subf %14, %13 : vector<16x128xf32>
    %16 = vector.shape_cast %15 : vector<16x128xf32> to vector<2x8x128xf32>
    %cst_7 = arith.constant dense<0.000000e+00> : vector<8x128xf32>
    %17 = vector.multi_reduction <add>, %16, %cst_7 [0] : vector<2x8x128xf32> to vector<8x128xf32>
    %18 = arith.addf %0, %17 : vector<8x128xf32>
    %c0_8 = arith.constant 0 : index
    %c0_9 = arith.constant 0 : index
    %19 = vector.load %arg3[%c0_8, %c0_9] : memref<8x128xf32, #tpu.memory_space<vmem>>, vector<8x128xf32>
    tpu.vector_store %arg3[%c0_8, %c0_9], %18 {strides = array<i32>} : memref<8x128xf32, #tpu.memory_space<vmem>>, vector<8x128xf32>,
    return
  }
  func.func @transform_0(%arg0: i32) -> (i32, i32) {
    %c0_i32 = arith.constant 0 : i32
    %c0_i32_0 = arith.constant 0 : i32
    return %arg0, %c0_i32 : i32, i32
  }
  func.func @transform_1(%arg0: i32) -> (i32, i32) {
    %c0_i32 = arith.constant 0 : i32
    %c0_i32_0 = arith.constant 0 : i32
    return %arg0, %c0_i32 : i32, i32
  }
  func.func @transform_2(%arg0: i32) -> (i32, i32) {
    %c0_i32 = arith.constant 0 : i32
    %c0_i32_0 = arith.constant 0 : i32
    return %arg0, %c0_i32 : i32, i32
  }
}

</mosaic_0001>

<bundles_post_ra>
// kernel: tpu_custom_call.1
= control target key start
LH: loop header
LB: loop body
LE: loop exit
PB: predicated region body
PF: predicated region fallthrough
CT: control target
= control target key end

     0   :  { %7 = vsyncpa [#allocation3], 0  ;;  %s226_s0 = inlined_call_operand.hbm [shape: f32[16,128], index: 0, kind: input, shape index: {}]   ;;  %s227_s1 = inlined_call_operand.hbm [shape: f32[16,128], index: 1, kind: input, shape index: {}]   ;;  %s228_s2 = inlined_call_operand.hbm [shape: f32[8,128], index: 2, kind: output, shape index: {}]  }
   0x1   :  { %8 = vsyncpa [#allocation6], 0 }
   0x2   :  { %9 = vsyncpa [#allocation4], 0  ;;  %s170_s9 = smov [#allocation2]   ;;  %s98_s13 = scalar_lea.hbm %s226_s0, 256 }
   0x3   :  { %s15_s10 = sshll.u32 %s170_s9, 4  ;;  %p99_p0 = scmp.ne.s32.totalorder %s226_s0, %s98_s13  ;;  %s16_s10 = int_to_ptr.vmem [resolvable:$true] %s15_s10 }
   0x4   :  { %p102_p1 = scmp.lt.u32.totalorder %s98_s13, %s226_s0 }
   0x6   :  { %p104_p2 = pnand %p102_p1, %p99_p0 }
   0x8   :  { %107 = shalt.err (!%p104_p2)
}
   0x9   :  { %s108_s18 = scalar_lea.vmem %s16_s10, 256  ;;  %p113_p4 = scmp.lt.s32.totalorder %s16_s10, %s16_s10 }
   0xa   :  { %p109_p3 = scmp.ne.s32.totalorder %s16_s10, %s108_s18  ;;  %p114_p5 = scmp.lt.s32.totalorder %s108_s18, %s108_s18 }
   0xc   :  { %p115_p6 = por %p114_p5, %p113_p4 }
   0xe   :  { %p116_p7 = pnand %p115_p6, %p109_p3 }
  0x10   :  { %119 = shalt.err (!%p116_p7)
}
  0x11   :  { %s171_s19 = smov 128   ;;  %s172_s20 = smov 8  }
  0x12   :  { %21 = dma.hbm_to_vmem [thread:$0]  %s226_s0, 256, %s16_s10, [#allocation3], %s171_s19, %s171_s19, %s172_s20  }
  0x13   :  { %s173_s23 = smov [#allocation5]   ;;  %s120_s27 = scalar_lea.hbm %s227_s1, 256 }
  0x14   :  { %s27_s24 = sshll.u32 %s173_s23, 4  ;;  %p121_p8 = scmp.ne.s32.totalorder %s227_s1, %s120_s27  ;;  %s28_s24 = int_to_ptr.vmem [resolvable:$true] %s27_s24 }
  0x15   :  { %p124_p9 = scmp.lt.u32.totalorder %s120_s27, %s227_s1 }
  0x17   :  { %p126_p10 = pnand %p124_p9, %p121_p8 }
  0x19   :  { %129 = shalt.err (!%p126_p10)
}
  0x1a   :  { %s130_s4 = scalar_lea.vmem %s28_s24, 256  ;;  %p135_p12 = scmp.lt.s32.totalorder %s28_s24, %s28_s24 }
  0x1b   :  { %p131_p11 = scmp.ne.s32.totalorder %s28_s24, %s130_s4  ;;  %p136_p13 = scmp.lt.s32.totalorder %s130_s4, %s130_s4 }
  0x1d   :  { %p137_p0 = por %p136_p13, %p135_p12 }
  0x1f   :  { %p138_p1 = pnand %p137_p0, %p131_p11 }
  0x21   :  { %141 = shalt.err (!%p138_p1)
}
  0x22   :  { %33 = dma.hbm_to_vmem [thread:$0]  %s227_s1, 256, %s28_s24, [#allocation6], %s171_s19, %s171_s19, %s172_s20  }
  0x23   :  { %164 = dma.done.wait [#allocation3], 256  }
  0x24   :  { %165 = vsyncadd [#allocation3], 4294967040 }
  0x25   :  { %166 = dma.done.wait [#allocation6], 256  }
  0x26   :  { %167 = vsyncadd [#allocation6], 4294967040  ;;  %v40_v0 = vld [vmem:[#allocation2] sm:$0xff]  ;;  %v41_v1 = vld [vmem:[#allocation2 + $0x8] sm:$0xff]  ;;  %s174_s1 = smov [#allocation7]  }
  0x27   :  { %90 = vlog2.f32 %v40_v0  ;;  %v50_v2 = vsub.f32 1.0, %v40_v0  ;;  %v51_v3 = vsub.f32 1.0, %v41_v1  ;;  %v42_v15 = vld [vmem:[#allocation5] sm:$0xff]  ;;  %v43_v17 = vld [vmem:[#allocation5 + $0x8] sm:$0xff]  ;;  %s75_s6 = sshll.u32 %s174_s1, 4  ;;  %s76_s6 = int_to_ptr.vmem [resolvable:$true] %s75_s6 }
  0x28   :  { %92 = vlog2.f32 %v41_v1  ;;  %s142_s7 = scalar_lea.vmem %s76_s6, 128  ;;  %p147_p3 = scmp.lt.s32.totalorder %s76_s6, %s76_s6 }
  0x29   :  { %94 = vlog2.f32 %v50_v2  ;;  %p143_p2 = scmp.ne.s32.totalorder %s76_s6, %s142_s7  ;;  %p148_p4 = scmp.lt.s32.totalorder %s142_s7, %s142_s7 }
  0x2a   :  { %96 = vlog2.f32 %v51_v3 }
  0x2b   :  { %p149_p5 = por %p148_p4, %p147_p3 }
  0x2d   :  { %p150_p6 = pnand %p149_p5, %p143_p2 }
  0x31   :  { %v91_v4 = vpop.eup %90 }
  0x32   :  { %v93_v5 = vpop.eup %92  ;;  %v45_v6 = vmul.f32 0.6931472, %v91_v4 }
  0x33   :  { %v95_v7 = vpop.eup %94  ;;  %v47_v8 = vmul.f32 0.6931472, %v93_v5 }
  0x34   :  { %v97_v9 = vpop.eup %96  ;;  %v48_v10 = vmax.f32 %v45_v6, -100.0  ;;  %v53_v11 = vmul.f32 0.6931472, %v95_v7 }
  0x35   :  { %v49_v12 = vmax.f32 %v47_v8, -100.0  ;;  %v55_v13 = vmul.f32 0.6931472, %v97_v9 }
  0x36   :  { %v56_v14 = vmax.f32 %v53_v11, -100.0 }
  0x37   :  { %v57_v16 = vmax.f32 %v55_v13, -100.0 }
  0x38   :  { %v58_v18 = vsub.f32 %v48_v10, %v56_v14 }
  0x39   :  { %v59_v19 = vsub.f32 %v49_v12, %v57_v16 }
  0x3a   :  { %v60_v20 = vmul.f32 %v58_v18, %v42_v15 }
  0x3b   :  { %v61_v21 = vmul.f32 %v59_v19, %v43_v17 }
  0x3c   :  { %v62_v22 = vadd.f32 %v60_v20, %v56_v14 }
  0x3d   :  { %v63_v23 = vadd.f32 %v61_v21, %v57_v16 }
  0x3e   :  { %v64_v24 = vsub.f32 0.0, %v62_v22 }
  0x3f   :  { %v65_v25 = vsub.f32 0.0, %v63_v23 }
  0x41   :  { %v66_v26 = vadd.f32 %v65_v25, %v64_v24 }
  0x43   :  { %68 = vst [vmem:[#allocation7] sm:$0xff] %v66_v26 }
  0x44   :  { %153 = shalt.err (!%p150_p6)
}
  0x45   :  { %s154_s10 = scalar_lea.hbm %s228_s2, 128 }
  0x46   :  { %p155_p7 = scmp.ne.s32.totalorder %s228_s2, %s154_s10  ;;  %p158_p8 = scmp.lt.u32.totalorder %s154_s10, %s228_s2 }
  0x48   :  { %p160_p9 = pnand %p158_p8, %p155_p7 }
  0x4a   :  { %163 = shalt.err (!%p160_p9)
}
  0x4b   :  { %78 = dma.vmem_to_hbm [thread:$0]  %s76_s6, 128, %s228_s2, [#allocation4]  }
  0x4c   :  { %168 = dma.done.wait [#allocation4], 128  }
  0x4d   :  { %169 = vsyncadd [#allocation4], 4294967168 }
  0x4e   :  { %82 = vsyncpa [#allocation3], 1 }
  0x4f   :  { %83 = vsyncpa [#allocation6], 1 }
  0x50   :  { %84 = vsyncpa [#allocation4], 1 }

</bundles_post_ra>
